<compile_context>
chip_gen: v7x
topology: tpu7x:2x2x1
jax: 0.10.0
libtpu: 0.0.40
codegen_flags: <defaults>
</compile_context>

<pallas_src>
import functools

import jax
import jax.numpy as jnp
from jax.experimental import pallas as pl
from jax.experimental.pallas import tpu as pltpu


def _round_up(n, m):
    return ((n + m - 1) // m) * m


def _netd_kernel(pk_ref, w1a_ref, w1b_ref, b1_ref,
                 w2_ref, b2_ref, w3_ref, b3_ref,
                 o_ref, *, d):
    pk = pk_ref[...]                     # [tb, 4*D]  (x | m | g | h)
    x = pk[:, 0 * d:1 * d]
    m = pk[:, 1 * d:2 * d]
    g = pk[:, 2 * d:3 * d]
    h = pk[:, 3 * d:4 * d]

    # inp = m * x + (1 - m) * g  (lerp kept so non-binary masks stay exact).
    mixed = m * x + (1.0 - m) * g

    # fc1 as two matmuls over the two feature halves (no lane-axis concat).
    a1 = jnp.dot(mixed, w1a_ref[...], preferred_element_type=jnp.float32)
    a1 = a1 + jnp.dot(h, w1b_ref[...], preferred_element_type=jnp.float32)
    a1 = jnp.maximum(a1 + b1_ref[...], 0.0)                  # [tb, 256]

    # fc2 + ReLU
    a2 = jnp.dot(a1, w2_ref[...], preferred_element_type=jnp.float32)
    a2 = jnp.maximum(a2 + b2_ref[...], 0.0)                  # [tb, 128]

    # fc3 + sigmoid
    a3 = jnp.dot(a2, w3_ref[...], preferred_element_type=jnp.float32)
    a3 = a3 + b3_ref[...]                                    # [tb, D]

    t = jnp.exp(-a3)                                          # EUP
    o_ref[...] = pl.reciprocal(1.0 + t, approx=True)          # EUP, not VALU


def prepare_params(params, feature_dim):
    """One-time weight prep (hoisted out of the forward call).

    Splits fc1's weight into the halves acting on [mixed | h] so the kernel
    never has to concatenate along the lane axis.
    """
    w1, b1, w2, b2, w3, b3 = params
    D = feature_dim
    assert w1.shape == (2 * D, 256)
    assert w2.shape == (256, 128)
    assert w3.shape == (128, D)
    return (w1[:D], w1[D:], b1, w2, b2, w3, b3)


def netd_forward(x, m, g, h, prepared_params, *, tile_b=1024, interpret=False):
    """NetD forward pass as a single batch-tiled Pallas call."""
    w1a, w1b, b1, w2, b2, w3, b3 = prepared_params
    B, D = x.shape
    H1 = w1a.shape[1]    # 256
    H2 = w2.shape[1]     # 128

    # One packed activation array -> one DMA stream per grid step.
    packed = jnp.concatenate([x, m, g, h], axis=1)            # [B, 4*D]

    # Batch tile: large (mem/overhead-bound), multiple of 8 sublanes, but
    # capped so there are >= 2 grid steps (v7x megacore sharding).
    tb = min(tile_b, _round_up(B, 8))
    if B > 8:
        tb = min(tb, _round_up(pl.cdiv(B, 2), 8))
    tb = max(8, (tb // 8) * 8)
    grid = (pl.cdiv(B, tb),)                                  # ragged last block OK

    in_spec_act = pl.BlockSpec((tb, 4 * D), lambda i: (i, 0))
    out_spec = pl.BlockSpec((tb, D), lambda i: (i, 0))

    def resident(shape):
        # Constant block index -> buffer stays VMEM-resident, no re-DMA
        # across grid steps.
        return pl.BlockSpec(shape, lambda i: (0, 0))

    weight_elems = 2 * D * H1 + H1 * H2 + H2 * D
    flops = 2 * B * (2 * D * H1 + H1 * H2 + H2 * D)
    bytes_accessed = (B * 4 * D * 4                 # packed activations
                      + weight_elems * 4            # weights
                      + (H1 + H2 + D) * 4           # biases
                      + B * D * 4)                  # output
    cost = pl.CostEstimate(flops=flops, transcendentals=B * D,
                           bytes_accessed=bytes_accessed)

    out = pl.pallas_call(
        functools.partial(_netd_kernel, d=D),
        out_shape=jax.ShapeDtypeStruct((B, D), jnp.float32),
        grid=grid,
        in_specs=[
            in_spec_act,
            resident(w1a.shape), resident(w1b.shape), resident(b1.shape),
            resident(w2.shape), resident(b2.shape),
            resident(w3.shape), resident(b3.shape),
        ],
        out_specs=out_spec,
        compiler_params=pltpu.CompilerParams(
            dimension_semantics=("parallel",)),
        cost_estimate=cost,
        interpret=interpret,
    )(packed, w1a, w1b, b1, w2, b2, w3, b3)

    return out


def init_params(key, feature_dim):
    """Parameters matching NetD.init_weight(): xavier-normal weights.

    The PyTorch module only re-initializes the weights; nn.Linear's default
    uniform(-1/sqrt(fan_in), 1/sqrt(fan_in)) biases are kept, so biases here
    are drawn from that same distribution.  Weights are stored as
    (in_features, out_features) so the kernel computes y = x @ W + b
    (equivalent to PyTorch's x @ W.T with its (out, in) layout).
    """
    def xavier_normal(k, fan_in, fan_out):
        std = jnp.sqrt(2.0 / (fan_in + fan_out))
        return std * jax.random.normal(k, (fan_in, fan_out), dtype=jnp.float32)

    def bias_uniform(k, fan_in, fan_out):
        bound = 1.0 / jnp.sqrt(fan_in)
        return jax.random.uniform(k, (1, fan_out), dtype=jnp.float32,
                                  minval=-bound, maxval=bound)

    k1, k2, k3, k4, k5, k6 = jax.random.split(key, 6)
    w1 = xavier_normal(k1, 2 * feature_dim, 256)
    b1 = bias_uniform(k4, 2 * feature_dim, 256)
    w2 = xavier_normal(k2, 256, 128)
    b2 = bias_uniform(k5, 256, 128)
    w3 = xavier_normal(k3, 128, feature_dim)
    b3 = bias_uniform(k6, 128, feature_dim)
    return (w1, b1, w2, b2, w3, b3)


def netd_reference(x, m, g, h, params):
    w1, b1, w2, b2, w3, b3 = params
    inp = jnp.concatenate([m * x + (1.0 - m) * g, h], axis=1)
    a1 = jnp.maximum(inp @ w1 + b1, 0.0)
    a2 = jnp.maximum(a1 @ w2 + b2, 0.0)
    return jax.nn.sigmoid(a2 @ w3 + b3)


if __name__ == "__main__":
    feature_dim = 16
    batch = 40          # not a tile multiple -> exercises the ragged last block

    key = jax.random.PRNGKey(0)
    kx, km, kg, kh, kp = jax.random.split(key, 5)

    x = jax.random.normal(kx, (batch, feature_dim), dtype=jnp.float32)
    m = (jax.random.uniform(km, (batch, feature_dim)) > 0.5).astype(jnp.float32)
    g = jax.random.normal(kg, (batch, feature_dim), dtype=jnp.float32)
    h = jax.random.uniform(kh, (batch, feature_dim), dtype=jnp.float32)

    params = init_params(kp, feature_dim)
    prepared = prepare_params(params, feature_dim)
    ref = netd_reference(x, m, g, h, params)

    # Tolerance covers the EUP approx-reciprocal sigmoid (~1e-4..1e-3 absolute).
    out = netd_forward(x, m, g, h, prepared)
    out = jax.block_until_ready(out)
    assert out.shape == (batch, feature_dim)
    assert jnp.allclose(out, ref, atol=2e-3, rtol=2e-3), "mismatch vs reference"

    print("KERNEL_OK")
</pallas_src>

<mosaic_0001>
module attributes {stable_mosaic.version = 11 : i64} {
  func.func @_netd_kernel(%arg0: i32, %arg1: memref<24x64xf32, #tpu.memory_space<vmem>>, %arg2: memref<16x256xf32, #tpu.memory_space<vmem>>, %arg3: memref<16x256xf32, #tpu.memory_space<vmem>>, %arg4: memref<1x256xf32, #tpu.memory_space<vmem>>, %arg5: memref<256x128xf32, #tpu.memory_space<vmem>>, %arg6: memref<1x128xf32, #tpu.memory_space<vmem>>, %arg7: memref<128x16xf32, #tpu.memory_space<vmem>>, %arg8: memref<1x16xf32, #tpu.memory_space<vmem>>, %arg9: memref<24x16xf32, #tpu.memory_space<vmem>>) attributes {dimension_semantics = [#tpu.dimension_semantics<parallel>], iteration_bounds = array<i64: 2>, scalar_prefetch = 0 : i64, scratch_operands = 0 : i64, tpu.core_type = #tpu.core_type<tc>, window_params = [{transform_indices = @transform_0, window_bounds = array<i64: 24, 64>}, {pipeline_mode = #tpu.pipeline_mode<synchronous>, transform_indices = @transform_1, window_bounds = array<i64: 16, 256>}, {pipeline_mode = #tpu.pipeline_mode<synchronous>, transform_indices = @transform_2, window_bounds = array<i64: 16, 256>}, {pipeline_mode = #tpu.pipeline_mode<synchronous>, transform_indices = @transform_3, window_bounds = array<i64: 1, 256>}, {pipeline_mode = #tpu.pipeline_mode<synchronous>, transform_indices = @transform_4, window_bounds = array<i64: 256, 128>}, {pipeline_mode = #tpu.pipeline_mode<synchronous>, transform_indices = @transform_5, window_bounds = array<i64: 1, 128>}, {pipeline_mode = #tpu.pipeline_mode<synchronous>, transform_indices = @transform_6, window_bounds = array<i64: 128, 16>}, {pipeline_mode = #tpu.pipeline_mode<synchronous>, transform_indices = @transform_7, window_bounds = array<i64: 1, 16>}, {transform_indices = @transform_8, window_bounds = array<i64: 24, 16>}]} {
    %c0 = arith.constant 0 : index
    %c0_0 = arith.constant 0 : index
    %0 = vector.load %arg1[%c0, %c0_0] : memref<24x64xf32, #tpu.memory_space<vmem>>, vector<24x64xf32>
    %1 = vector.extract_strided_slice %0 {offsets = [0, 0], sizes = [24, 16], strides = [1, 1]} : vector<24x64xf32> to vector<24x16xf32>
    %2 = vector.extract_strided_slice %0 {offsets = [0, 16], sizes = [24, 16], strides = [1, 1]} : vector<24x64xf32> to vector<24x16xf32>
    %3 = vector.extract_strided_slice %0 {offsets = [0, 32], sizes = [24, 16], strides = [1, 1]} : vector<24x64xf32> to vector<24x16xf32>
    %4 = vector.extract_strided_slice %0 {offsets = [0, 48], sizes = [24, 16], strides = [1, 1]} : vector<24x64xf32> to vector<24x16xf32>
    %5 = arith.mulf %2, %1 : vector<24x16xf32>
    %cst = arith.constant 1.000000e+00 : f32
    %6 = vector.broadcast %cst : f32 to vector<24x16xf32>
    %7 = arith.subf %6, %2 : vector<24x16xf32>
    %8 = arith.mulf %7, %3 : vector<24x16xf32>
    %9 = arith.addf %5, %8 : vector<24x16xf32>
    %c0_1 = arith.constant 0 : index
    %c0_2 = arith.constant 0 : index
    %10 = vector.load %arg2[%c0_1, %c0_2] : memref<16x256xf32, #tpu.memory_space<vmem>>, vector<16x256xf32>
    %cst_3 = arith.constant dense<0.000000e+00> : vector<24x256xf32>
    %11 = tpu.matmul %9, %10, %cst_3 {dimension_numbers = #tpu.dot_dimension_numbers<[1], [0], [0], [1], [0, 0, 1, 1], [], []>} : vector<24x16xf32>, vector<16x256xf32>, vector<24x256xf32> -> vector<24x256xf32>
    %c0_4 = arith.constant 0 : index
    %c0_5 = arith.constant 0 : index
    %12 = vector.load %arg3[%c0_4, %c0_5] : memref<16x256xf32, #tpu.memory_space<vmem>>, vector<16x256xf32>
    %cst_6 = arith.constant dense<0.000000e+00> : vector<24x256xf32>
    %13 = tpu.matmul %4, %12, %cst_6 {dimension_numbers = #tpu.dot_dimension_numbers<[1], [0], [0], [1], [0, 0, 1, 1], [], []>} : vector<24x16xf32>, vector<16x256xf32>, vector<24x256xf32> -> vector<24x256xf32>
    %14 = arith.addf %11, %13 : vector<24x256xf32>
    %c0_7 = arith.constant 0 : index
    %c0_8 = arith.constant 0 : index
    %15 = vector.load %arg4[%c0_7, %c0_8] : memref<1x256xf32, #tpu.memory_space<vmem>>, vector<1x256xf32>
    %16 = vector.broadcast %15 : vector<1x256xf32> to vector<24x256xf32>
    %17 = arith.addf %14, %16 : vector<24x256xf32>
    %cst_9 = arith.constant 0.000000e+00 : f32
    %18 = vector.broadcast %cst_9 : f32 to vector<24x256xf32>
    %19 = arith.maximumf %17, %18 : vector<24x256xf32>
    %c0_10 = arith.constant 0 : index
    %c0_11 = arith.constant 0 : index
    %20 = vector.load %arg5[%c0_10, %c0_11] : memref<256x128xf32, #tpu.memory_space<vmem>>, vector<256x128xf32>
    %cst_12 = arith.constant dense<0.000000e+00> : vector<24x128xf32>
    %21 = tpu.matmul %19, %20, %cst_12 {dimension_numbers = #tpu.dot_dimension_numbers<[1], [0], [0], [1], [0, 0, 1, 1], [], []>} : vector<24x256xf32>, vector<256x128xf32>, vector<24x128xf32> -> vector<24x128xf32>
    %c0_13 = arith.constant 0 : index
    %c0_14 = arith.constant 0 : index
    %22 = vector.load %arg6[%c0_13, %c0_14] : memref<1x128xf32, #tpu.memory_space<vmem>>, vector<1x128xf32>
    %23 = vector.broadcast %22 : vector<1x128xf32> to vector<24x128xf32>
    %24 = arith.addf %21, %23 : vector<24x128xf32>
    %cst_15 = arith.constant 0.000000e+00 : f32
    %25 = vector.broadcast %cst_15 : f32 to vector<24x128xf32>
    %26 = arith.maximumf %24, %25 : vector<24x128xf32>
    %c0_16 = arith.constant 0 : index
    %c0_17 = arith.constant 0 : index
    %27 = vector.load %arg7[%c0_16, %c0_17] : memref<128x16xf32, #tpu.memory_space<vmem>>, vector<128x16xf32>
    %cst_18 = arith.constant dense<0.000000e+00> : vector<24x16xf32>
    %28 = tpu.matmul %26, %27, %cst_18 {dimension_numbers = #tpu.dot_dimension_numbers<[1], [0], [0], [1], [0, 0, 1, 1], [], []>} : vector<24x128xf32>, vector<128x16xf32>, vector<24x16xf32> -> vector<24x16xf32>
    %c0_19 = arith.constant 0 : index
    %c0_20 = arith.constant 0 : index
    %29 = vector.load %arg8[%c0_19, %c0_20] : memref<1x16xf32, #tpu.memory_space<vmem>>, vector<1x16xf32>
    %30 = vector.broadcast %29 : vector<1x16xf32> to vector<24x16xf32>
    %31 = arith.addf %28, %30 : vector<24x16xf32>
    %cst_21 = arith.constant 0.000000e+00 : f32
    %32 = vector.broadcast %cst_21 : f32 to vector<24x16xf32>
    %33 = arith.subf %32, %31 : vector<24x16xf32>
    %34 = math.exp %33 : vector<24x16xf32>
    %cst_22 = arith.constant 1.000000e+00 : f32
    %35 = vector.broadcast %cst_22 : f32 to vector<24x16xf32>
    %36 = arith.addf %35, %34 : vector<24x16xf32>
    %37 = tpu.reciprocal %36 {approx = true} : vector<24x16xf32> -> vector<24x16xf32>
    %c0_23 = arith.constant 0 : index
    %c0_24 = arith.constant 0 : index
    %38 = vector.load %arg9[%c0_23, %c0_24] : memref<24x16xf32, #tpu.memory_space<vmem>>, vector<24x16xf32>
    tpu.vector_store %arg9[%c0_23, %c0_24], %37 {strides = array<i32>} : memref<24x16xf32, #tpu.memory_space<vmem>>, vector<24x16xf32>,
    return
  }
  func.func @transform_0(%arg0: i32) -> (i32, i32) {
    %c0_i32 = arith.constant 0 : i32
    %c0_i32_0 = arith.constant 0 : i32
    return %arg0, %c0_i32 : i32, i32
  }
  func.func @transform_1(%arg0: i32) -> (i32, i32) {
    %c0_i32 = arith.constant 0 : i32
    %c0_i32_0 = arith.constant 0 : i32
    %c0_i32_1 = arith.constant 0 : i32
    return %c0_i32, %c0_i32_0 : i32, i32
  }
  func.func @transform_2(%arg0: i32) -> (i32, i32) {
    %c0_i32 = arith.constant 0 : i32
    %c0_i32_0 = arith.constant 0 : i32
    %c0_i32_1 = arith.constant 0 : i32
    return %c0_i32, %c0_i32_0 : i32, i32
  }
  func.func @transform_3(%arg0: i32) -> (i32, i32) {
    %c0_i32 = arith.constant 0 : i32
    %c0_i32_0 = arith.constant 0 : i32
    %c0_i32_1 = arith.constant 0 : i32
    return %c0_i32, %c0_i32_0 : i32, i32
  }
  func.func @transform_4(%arg0: i32) -> (i32, i32) {
    %c0_i32 = arith.constant 0 : i32
    %c0_i32_0 = arith.constant 0 : i32
    %c0_i32_1 = arith.constant 0 : i32
    return %c0_i32, %c0_i32_0 : i32, i32
  }
  func.func @transform_5(%arg0: i32) -> (i32, i32) {
    %c0_i32 = arith.constant 0 : i32
    %c0_i32_0 = arith.constant 0 : i32
    %c0_i32_1 = arith.constant 0 : i32
    return %c0_i32, %c0_i32_0 : i32, i32
  }
  func.func @transform_6(%arg0: i32) -> (i32, i32) {
    %c0_i32 = arith.constant 0 : i32
    %c0_i32_0 = arith.constant 0 : i32
    %c0_i32_1 = arith.constant 0 : i32
    return %c0_i32, %c0_i32_0 : i32, i32
  }
  func.func @transform_7(%arg0: i32) -> (i32, i32) {
    %c0_i32 = arith.constant 0 : i32
    %c0_i32_0 = arith.constant 0 : i32
    %c0_i32_1 = arith.constant 0 : i32
    return %c0_i32, %c0_i32_0 : i32, i32
  }
  func.func @transform_8(%arg0: i32) -> (i32, i32) {
    %c0_i32 = arith.constant 0 : i32
    %c0_i32_0 = arith.constant 0 : i32
    return %arg0, %c0_i32 : i32, i32
  }
}

</mosaic_0001>

<bundles_post_ra>
// kernel: tpu_custom_call.1
= control target key start
LH: loop header
LB: loop body
LE: loop exit
PB: predicated region body
PF: predicated region fallthrough
CT: control target
= control target key end

     0   :  { %13 = vsyncpa [#allocation3], 0  ;;  %s1582_s27 = smov 0   ;;  %s1584_s28 = smov 0   ;;  %s1812_s0 = inlined_call_operand.vmem [shape: f32[40,64], index: 0, kind: input, shape index: {}]   ;;  %s1813_s1 = inlined_call_operand.vmem [shape: f32[16,256], index: 1, kind: input, shape index: {}]   ;;  %s1814_s2 = inlined_call_operand.vmem [shape: f32[16,256], index: 2, kind: input, shape index: {}]   ;;  %s1815_s3 = inlined_call_operand.vmem [shape: f32[1,256], index: 3, kind: input, shape index: {}]   ;;  %s1816_s4 = inlined_call_operand.hbm [shape: f32[256,128], index: 4, kind: input, shape index: {}]   ;;  %s1817_s5 = inlined_call_operand.vmem [shape: f32[1,128], index: 5, kind: input, shape index: {}]   ;;  %s1818_s6 = inlined_call_operand.vmem [shape: f32[128,16], index: 6, kind: input, shape index: {}]   ;;  %s1819_s7 = inlined_call_operand.vmem [shape: f32[1,16], index: 7, kind: input, shape index: {}]   ;;  %s1820_s8 = inlined_call_operand.vmem [shape: f32[40,16], index: 8, kind: output, shape index: {}]  }
   0x1   :  { %s1586_s29 = smov 0  }
   0x2 LB: > { %s1595_s30 = sadd.s32 4294967295, %s1494_s29   ;;  %s1597_s9 = sadd.s32 1, %s1494_s29   ;;  %s1494_s29 = sphi %s1586_s29, %s1832_s29   ;;  %s1490_s28 = sphi %s1584_s28, %s1831_s28   ;;  %s1486_s27 = sphi %s1582_s27, %s1830_s27  }
   0x3   : > { %s196_s10 = ssub.s32 %s1494_s29, %s1597_s9  ;;  %s199_s11 = sadd.s32 1, %s1490_s28 }
   0x4   : > { %p197_p0 = scmp.eq.s32.totalorder %s196_s10, 0  ;;  %p209_p1 = scmp.ne.s32.totalorder %s1490_s28, %s1486_s27 }
   0x5   : > { %p210_p2 = scmp.eq.s32.totalorder %s1595_s30, 1  ;;  %p1085_p3 = scmp.ge.s32.totalorder %s1494_s29, 1 }
   0x6   : > { %s1605_s12 = scalar_select %p197_p0, %s1490_s28, %s199_s11  }
   0x7   : > { %p1607_p4 = por %p210_p2, %p209_p1  ;;  %p223_p5 = scmp.lt.s32.totalorder %s1494_s29, 3 }
   0x8   : > { %p1821_p6 = scmp.eq.s32.totalorder %s1595_s30, 0  ;;  %s1528_s15 = smov [#allocation2]  }
   0x9   : > { %s1823_s13 = scalar_select %p1607_p4, 1, 0 }
   0xa   : > { %p1612_p7 = pnand %p1085_p3, %p223_p5  ;;  %s244_s16 = sshll.u32 %s1528_s15, 4  ;;  %s245_s16 = int_to_ptr.vmem [resolvable:$true] %s244_s16 }
   0xb   : > { %s1408_s20 = scalar_lea.hbm %s1816_s4, 4096 }
   0xc   : > { %s1824_s14 = scalar_select %p1612_p7, 1, 0 }
   0xd   : > { %p1288_p8 = pneg %p1612_p7  ;;  %p1409_p10 = scmp.ne.s32.totalorder %s1816_s4, %s1408_s20 }
   0xe   : > { %p1415_p0 = scmp.lt.u32.totalorder %s1408_s20, %s1816_s4 }
   0xf   : > { %p1620_p9 = pnand %p1821_p6, %p1288_p8 }
  0x11   : > { %p1410_p11 = pneg %p1620_p9 }
  0x13   : > { %p1411_p12 = pnand %p1410_p11, %p1409_p10 }
  0x15   : > { %p1412_p13 = pneg %p1411_p12 }
  0x17   : > { %p1417_p1 = pnand %p1415_p0, %p1412_p13 }
  0x19   : > { %1420 = shalt.err (!%p1417_p1)
}
  0x1a   : > { %s1421_s25 = scalar_lea.vmem %s245_s16, 4096  ;;  %p1429_p8 = scmp.lt.s32.totalorder %s245_s16, %s245_s16 }
  0x1b   : > { %p1422_p2 = scmp.ne.s32.totalorder %s245_s16, %s1421_s25  ;;  %p1430_p6 = scmp.lt.s32.totalorder %s1421_s25, %s1421_s25 }
  0x1d   : > { %p1424_p3 = pnand %p1422_p2, %p1410_p11  ;;  %p1431_p4 = por %p1430_p6, %p1429_p8 }
  0x1f   : > { %p1425_p5 = pneg %p1424_p3 }
  0x21   : > { %p1432_p7 = pnand %p1431_p4, %p1425_p5 }
  0x23   : > { %1435 = shalt.err (!%p1432_p7)
}
  0x24   : > { %s1529_s26 = smov 128   ;;  %s1530_s29 = smov 8  }
  0x25   : > { %1291 = dma.hbm_to_vmem [thread:$0]  (!%p1620_p9), %s1816_s4, 4096, %s245_s16, [#allocation3], %s1529_s26, %s1529_s26, %s1530_s29  }
  0x26   : > { %p1826_p10 = scmp.ne.s32.totalorder %s1824_s14, 0 }
  0x27   : > { %p1827_p12 = scmp.eq.s32.totalorder (!%p1826_p10), %s1595_s30, 0 }
  0x28   : > { %286 = sbr.rel (%p1826_p10) target bundleno = 1046 (0x416), region = 52 }
  0x2f   : > { %1481 = dma.done.wait (%p1827_p12), [#allocation3], 4096   ;;  %p1828_p11 = pmov %p1827_p12 }
  0x30   : > { %s1647_s15 = smul.u32 3, %s1595_s30  ;;  %s1531_s14 = smov 16   ;;  %v383_v3 = vld [vmem:[%s1814_s2 + $0x8] sm:$0xff]  ;;  %v385_v4 = vld [vmem:[%s1814_s2 + $0x18] sm:$0xff]  ;;  %v382_v5 = vld [vmem:[%s1814_s2] sm:$0xff]  ;;  %v1533_v13 = vmov 0.0  }
  0x31   : > { %1483 = vsyncadd (%p1828_p11), [#allocation3], 4294963200  ;;  %s1532_s29 = smov 112   ;;  %v1213_v6 = vpack.c.bf16 %v385_v4, %v383_v3  ;;  %v384_v7 = vld [vmem:[%s1814_s2 + $0x10] sm:$0xff]  ;;  %v379_v8 = vld [vmem:[%s1813_s1 + $0x8] sm:$0xff]  ;;  %463 = vmatprep.mubr.f32.mxu1 %v1533_v13  ;;  %561 = vmatprep.mubr.f32.mxu0 %v1533_v13  ;;  %s1534_s24 = smov 80  }
  0x32   : > { %p328_p4 = scmp.lt.s32.totalorder %s1647_s15, 4  ;;  %v1215_v9 = vpack.c.bf16 %v384_v7, %v382_v5  ;;  %v381_v10 = vld [vmem:[%s1813_s1 + $0x18] sm:$0xff]  ;;  %v378_v11 = vld [vmem:[%s1813_s1] sm:$0xff]  ;;  %v380_v12 = vld [vmem:[%s1813_s1 + $0x10] sm:$0xff]  ;;  %vm392_vm0 = vcmask 130048   ;;  %vm1536_vm1 = vmmov 0  }
  0x33   : > { %1214 = vmatprep.subr.bf16.mxu1 %v1213_v6  ;;  %v1217_v14 = vpack.c.bf16 %v381_v10, %v379_v8  ;;  %v1219_v15 = vpack.c.bf16 %v380_v12, %v378_v11  ;;  %v620_v22 = vld [vmem:[#allocation2 + $0x80] sm:$0xff]  ;;  %v621_v23 = vld [vmem:[#allocation2 + $0x88] sm:$0xff]  ;;  %v622_v35 = vld [vmem:[#allocation2 + $0x90] sm:$0xff]  ;;  %s320_s19 = sand.u32 1, %s1486_s27   ;;  %p1829_p6 = scmp.ne.s32.totalorder %s1823_s13, 0 }
  0x34   : > { %s329_s17 = scalar_select %p328_p4, %s1647_s15, 4  ;;  %1216 = vmatpush1.bf16.msra.mxu1 %v1215_v9  ;;  %v1221_v27 = vpack.c.bf16 %v621_v23, %v620_v22  ;;  %v604_v31 = vld [vmem:[#allocation2] sm:$0xff]  ;;  %v605_v32 = vld [vmem:[#allocation2 + $0x8] sm:$0xff]  ;;  %v623_v36 = vld [vmem:[#allocation2 + $0x98] sm:$0xff] }
  0x35   : > { %1218 = vmatprep.subr.bf16.mxu0 %v1217_v14  ;;  %v1223_v39 = vpack.c.bf16 %v605_v32, %v604_v31  ;;  %v1225_v41 = vpack.c.bf16 %v623_v36, %v622_v35  ;;  %v606_v42 = vld [vmem:[#allocation2 + $0x10] sm:$0xff]  ;;  %v607_v43 = vld [vmem:[#allocation2 + $0x18] sm:$0xff]  ;;  %v624_v45 = vld [vmem:[#allocation2 + $0xa0] sm:$0xff]  ;;  %s1283_s20 = smul.u32 24, %s320_s19  ;;  %s855_s27 = ssub.s32 (%p1829_p6), 5, %s1647_s15 }
  0x36   : > { %s1090_s18 = sshll.u32 %s329_s17, 3  ;;  %1220 = vmatpush1.bf16.msra.mxu0 %v1219_v15  ;;  %1222 = vmatprep.subr.bf16.mxu1 %v1221_v27  ;;  %v625_v46 = vld [vmem:[#allocation2 + $0xa8] sm:$0xff]  ;;  %v1227_v48 = vpack.c.bf16 %v607_v43, %v606_v42  ;;  %v608_v50 = vld [vmem:[#allocation2 + $0x20] sm:$0xff]  ;;  %v626_v53 = vld [vmem:[#allocation2 + $0xb0] sm:$0xff]  ;;  %s1111_s21 = smul.u32 (%p1829_p6), 24, %s1595_s30 }
  0x37   : > { %s331_s16 = scalar_lea.vmem %s1812_s0, %s1090_s18  ;;  %v1229_v49 = vpack.c.bf16 %v625_v46, %v624_v45  ;;  %v609_v51 = vld [vmem:[#allocation2 + $0x28] sm:$0xff]  ;;  %v627_v54 = vld [vmem:[#allocation2 + $0xb8] sm:$0xff]  ;;  %v610_v57 = vld [vmem:[#allocation2 + $0x30] sm:$0xff]  ;;  %p856_p7 = scmp.lt.s32.totalorder (%p1829_p6), %s855_s27, 3 }
  0x38   : > { %v343_v0 = vld [vmem:[%s331_s16 + $0x8] sm:$0xff]  ;;  %v342_v1 = vld [vmem:[%s331_s16] sm:$0xff]  ;;  %v344_v2 = vld [vmem:[%s331_s16 + $0x10] sm:$0xff]  ;;  %v1231_v55 = vpack.c.bf16 %v609_v51, %v608_v50  ;;  %v1233_v56 = vpack.c.bf16 %v627_v54, %v626_v53  ;;  %v582_v50 = vlaneseq  ;;  %s1768_s16 = scalar_lea.vmem [#allocation4], %s1283_s20  }
  0x39   : > { %350 = vrot.lane.b32.xlu1 %v343_v0, %s1531_s14  ;;  %348 = vrot.lane.b32.xlu0 %v342_v1, %s1531_s14  ;;  %v360_v18 = vsub.f32 1.0, %v342_v1  ;;  %v361_v19 = vsub.f32 1.0, %v343_v0  ;;  %v362_v26 = vsub.f32 1.0, %v344_v2  ;;  %v611_v58 = vld [vmem:[#allocation2 + $0x38] sm:$0xff]  ;;  %v628_v60 = vld [vmem:[#allocation2 + $0xc0] sm:$0xff]  ;;  %v629_v61 = vld [vmem:[#allocation2 + $0xc8] sm:$0xff] }
  0x3a   : > { %v1235_v62 = vpack.c.bf16 %v611_v58, %v610_v57  ;;  %v1237_v63 = vpack.c.bf16 %v629_v61, %v628_v60  ;;  %v631_v3 = vld [vmem:[#allocation2 + $0xd8] sm:$0xff]  ;;  %v614_v6 = vld [vmem:[#allocation2 + $0x50] sm:$0xff]  ;;  %v632_v12 = vld [vmem:[#allocation2 + $0xe0] sm:$0xff]  ;;  %v583_v51 = vshrl.u32 %v582_v50, 7 }
  0x3b   : > { %v615_v7 = vld [vmem:[#allocation2 + $0x58] sm:$0xff]  ;;  %v633_v14 = vld [vmem:[#allocation2 + $0xe8] sm:$0xff]  ;;  %v618_v22 = vld [vmem:[#allocation2 + $0x70] sm:$0xff] }
  0x3c   : > { %v1243_v8 = vpack.c.bf16 %v615_v7, %v614_v6  ;;  %v1245_v15 = vpack.c.bf16 %v633_v14, %v632_v12  ;;  %v619_v23 = vld [vmem:[#allocation2 + $0x78] sm:$0xff]  ;;  %v727_v27 = vld [vmem:[%s1818_s6 + $0x8] sm:$0xff]  ;;  %v730_v35 = vld [vmem:[%s1818_s6 + $0x20] sm:$0xff]  ;;  %v588_v54 = vsub.s32 1, %v583_v51 }
  0x3d   : > { %365 = vrot.lane.b32.xlu1 %v343_v0, %s1532_s29  ;;  %363 = vrot.lane.b32.xlu0 %v342_v1, %s1532_s29  ;;  %v729_v32 = vld [vmem:[%s1818_s6 + $0x18] sm:$0xff]  ;;  %v731_v36 = vld [vmem:[%s1818_s6 + $0x28] sm:$0xff] }
  0x3e   : > { %v735_v45 = vld [vmem:[%s1818_s6 + $0x48] sm:$0xff]  ;;  %v580_v53 = vld [vmem:[%s1815_s3] sm:$0x3] }
  0x3f   : > { %v589_v57 = vrot.slane %v580_v53, %v588_v54 }
  0x41   : > { %367 = vrot.lane.b32.xlu1 %v344_v2, %s1532_s29  ;;  %352 = vrot.lane.b32.xlu0 %v344_v2, %s1531_s14 }
  0x45   : > { %386 = vrot.lane.b32.xlu0 %v342_v1, %s1534_s24 }
  0x49   : > { %388 = vrot.lane.b32.xlu0 %v343_v0, %s1534_s24 }
  0x4d   : > { %390 = vrot.lane.b32.xlu0 %v344_v2, %s1534_s24  ;;  %s1783_s24 = scalar_lea.vmem (%p1829_p6), %s1820_s8, %s1111_s21  }
  0xab   : > { %v351_v16 = vpop.permute.xlu1 %350  ;;  %v349_v17 = vpop.permute.xlu0 %348 }
  0xac   : > { %v357_v24 = vmul.f32 %v349_v17, %v342_v1  ;;  %v358_v28 = vmul.f32 %v351_v16, %v343_v0  ;;  %v612_v0 = vld [vmem:[#allocation2 + $0x40] sm:$0xff]  ;;  %v613_v1 = vld [vmem:[#allocation2 + $0x48] sm:$0xff] }
  0xad   : > { %v1239_v4 = vpack.c.bf16 %v613_v1, %v612_v0  ;;  %v616_v16 = vld [vmem:[#allocation2 + $0x60] sm:$0xff]  ;;  %v617_v17 = vld [vmem:[#allocation2 + $0x68] sm:$0xff] }
  0xaf   : > { %v366_v20 = vpop.permute.xlu1 %365  ;;  %v364_v21 = vpop.permute.xlu0 %363 }
  0xb0   : > { %v372_v25 = vmul.f32 %v364_v21, %v360_v18  ;;  %v373_v29 = vmul.f32 %v366_v20, %v361_v19  ;;  %v1247_v18 = vpack.c.bf16 %v617_v17, %v616_v16  ;;  %v634_v19 = vld [vmem:[#allocation2 + $0xf0] sm:$0xff]  ;;  %v635_v20 = vld [vmem:[#allocation2 + $0xf8] sm:$0xff] }
  0xb1   : > { %v1249_v21 = vpack.c.bf16 %v635_v20, %v634_v19  ;;  %v739_v19 = vld [vmem:[%s1818_s6 + $0x68] sm:$0xff] }
  0xb2   : > { %v375_v30 = vadd.f32 %v372_v25, %v357_v24  ;;  %v376_v40 = vadd.f32 %v373_v29, %v358_v28  ;;  %v1251_v24 = vpack.c.bf16 %v619_v23, %v618_v22  ;;  %v728_v28 = vld [vmem:[%s1818_s6 + $0x10] sm:$0xff]  ;;  %v741_v22 = vld [vmem:[%s1818_s6 + $0x78] sm:$0xff] }
  0xb3   : > { %v368_v33 = vpop.permute.xlu1 %367  ;;  %v353_v34 = vpop.permute.xlu0 %352 }
  0xb4   : > { %485 = vrot.lane.b32.xlu1 %v375_v30, %s1532_s29  ;;  %v374_v37 = vmul.f32 %v368_v33, %v362_v26  ;;  %v359_v38 = vmul.f32 %v353_v34, %v344_v2  ;;  %v630_v2 = vld [vmem:[#allocation2 + $0xd0] sm:$0xff]  ;;  %v726_v26 = vld [vmem:[%s1818_s6] sm:$0xff]  ;;  %v1535_v30 = vmov 0.0|0.0   ;;  %v1257_v33 = vpack.c.bf16 %v729_v32, %v728_v28 }
  0xb5   : > { %v1241_v5 = vpack.c.bf16 %v631_v3, %v630_v2  ;;  %1253 = vmatprep.subr.bf16.mxu0 %v1535_v30  ;;  %v1254_v31 = vpack.c.bf16 %v727_v27, %v726_v26 }
  0xb6   : > { %v377_v47 = vadd.f32 %v374_v37, %v359_v38  ;;  %v1260_v38 = vpack.c.bf16 %v731_v36, %v730_v35 }
  0xb7   : > { %v387_v44 = vpop.permute.xlu0 %386 }
  0xb8   : > { %487 = vrot.lane.b32.xlu1 %v376_v40, %s1532_s29  ;;  %1091 = vmatmul.mubr.msk.f32.vlgmr.msra.gmra.mrb[0].mxu1 %vm392_vm0, %v387_v44  ;;  %v732_v40 = vld [vmem:[%s1818_s6 + $0x30] sm:$0xff]  ;;  %v734_v44 = vld [vmem:[%s1818_s6 + $0x40] sm:$0xff] }
  0xb9   : > { %469 = vmatprep.mubr.f32.mxu1 %v1533_v13  ;;  %1224 = vmatpush3.bf16.msra.mxu1 %v1223_v39  ;;  %v1266_v46 = vpack.c.bf16 %v735_v45, %v734_v44 }
  0xba   : > { %1226 = vmatprep.subr.bf16.mxu1 %v1225_v41  ;;  %v733_v41 = vld [vmem:[%s1818_s6 + $0x38] sm:$0xff] }
  0xbb   : > { %v389_v52 = vpop.permute.xlu0 %388  ;;  %v1263_v43 = vpack.c.bf16 %v733_v41, %v732_v40  ;;  %v1098_v40 = vld [vmem:[%s1819_s7] ss:$0 sm:$0xff] }
  0xbc   : > { %489 = vrot.lane.b32.xlu1 %v377_v47, %s1532_s29  ;;  %1092 = vmatmul.mubr.msk.f32.gmra.mrb[2].mxu1 %vm392_vm0, %v389_v52  ;;  %v736_v47 = vld [vmem:[%s1818_s6 + $0x50] sm:$0xff]  ;;  %v584_v52 = vsub.s32 0, %v583_v51 }
  0xbd   : > { %475 = vmatprep.mubr.f32.mxu1 %v1533_v13  ;;  %1228 = vmatpush3.bf16.msra.mxu1 %v1227_v48  ;;  %v737_v48 = vld [vmem:[%s1818_s6 + $0x58] sm:$0xff] }
  0xbe   : > { %1230 = vmatprep.subr.bf16.mxu1 %v1229_v49  ;;  %v1269_v49 = vpack.c.bf16 %v737_v48, %v736_v47 }
  0xbf   : > { %v391_v59 = vpop.permute.xlu0 %390 }
  0xc0   : > { %1093 = vmatmul.mubr.msk.f32.gmra.mrb[4].mxu1 %vm392_vm0, %v391_v59 }
  0xc1   : > { %1232 = vmatpush3.bf16.msra.mxu1 %v1231_v55  ;;  %v585_v55 = vrot.slane %v580_v53, %v584_v52 }
  0xc2   : > { %1234 = vmatprep.subr.bf16.mxu1 %v1233_v56 }
  0xc5   : > { %1236 = vmatpush3.bf16.msra.mxu1 %v1235_v62 }
  0xc6   : > { %1238 = vmatprep.subr.bf16.mxu1 %v1237_v63 }
  0xc9   : > { %1240 = vmatpush3.bf16.msra.mxu1 %v1239_v4 }
  0xca   : > { %1242 = vmatprep.subr.bf16.mxu1 %v1241_v5 }
  0xcd   : > { %1244 = vmatpush3.bf16.msra.mxu1 %v1243_v8 }
  0xce   : > { %1246 = vmatprep.subr.bf16.mxu1 %v1245_v15 }
  0xd1   : > { %1248 = vmatpush3.bf16.msra.mxu1 %v1247_v18  ;;  %v738_v18 = vld [vmem:[%s1818_s6 + $0x60] sm:$0xff] }
  0xd2   : > { %1250 = vmatprep.subr.bf16.mxu1 %v1249_v21  ;;  %v1272_v20 = vpack.c.bf16 %v739_v19, %v738_v18  ;;  %v740_v21 = vld [vmem:[%s1818_s6 + $0x70] sm:$0xff] }
  0xd3   : > { %v1275_v23 = vpack.c.bf16 %v741_v22, %v740_v21 }
  0xd5   : > { %1252 = vmatpush3.bf16.msra.mxu1 %v1251_v24 }
 0x126   : > { %v486_v9 = vpop.permute.xlu1 %485 }
 0x127   : > { %1094 = vmatmul.mubr.msk.f32.vlgmr.msra.gmra.mrb[0].mxu0 %vm392_vm0, %v486_v9 }
 0x128   : > { %567 = vmatprep.mubr.f32.mxu0 %v1533_v13  ;;  %1255 = vmatpush3.bf16.msra.mxu0 %v1254_v31 }
 0x129   : > { %1256 = vmatprep.subr.bf16.mxu0 %v1535_v30 }
 0x12a   : > { %v488_v10 = vpop.permute.xlu1 %487 }
 0x12b   : > { %1095 = vmatmul.mubr.msk.f32.gmra.mrb[2].mxu0 %vm392_vm0, %v488_v10 }
 0x12c   : > { %573 = vmatprep.mubr.f32.mxu0 %v1533_v13  ;;  %1258 = vmatpush3.bf16.msra.mxu0 %v1257_v33 }
 0x12d   : > { %1259 = vmatprep.subr.bf16.mxu0 %v1535_v30 }
 0x12e   : > { %v490_v11 = vpop.permute.xlu1 %489 }
 0x12f   : > { %1096 = vmatmul.mubr.msk.f32.gmra.mrb[4].mxu0 %vm392_vm0, %v490_v11 }
 0x130   : > { %1261 = vmatpush3.bf16.msra.mxu0 %v1260_v38  ;;  %1204 = vmatprep.mubr.msk.f32.mxu0 %vm1536_vm1, %v1533_v13 }
 0x131   : > { %1262 = vmatprep.subr.bf16.mxu0 %v1535_v30 }
 0x134   : > { %1264 = vmatpush3.bf16.msra.mxu0 %v1263_v43 }
 0x135   : > { %1265 = vmatprep.subr.bf16.mxu0 %v1535_v30 }
 0x138   : > { %1267 = vmatpush3.bf16.msra.mxu0 %v1266_v46 }
 0x139   : > { %1268 = vmatprep.subr.bf16.mxu0 %v1535_v30 }
 0x13c   : > { %1270 = vmatpush3.bf16.msra.mxu0 %v1269_v49 }
 0x13d   : > { %1271 = vmatprep.subr.bf16.mxu0 %v1535_v30 }
 0x140   : > { %1273 = vmatpush3.bf16.msra.mxu0 %v1272_v20 }
 0x141   : > { %1274 = vmatprep.subr.bf16.mxu0 %v1535_v30 }
 0x144   : > { %1276 = vmatpush3.bf16.msra.mxu0 %v1275_v23 }
 0x18b   : > { %v465_v25 = vpop.f32.mrb[0].mxu1 }
 0x18c   : > { %v467_v29 = vpop.f32.mrb[1].mxu1 }
 0x18f   : > { %v471_v34 = vpop.f32.mrb[2].mxu1 }
 0x190   : > { %v473_v37 = vpop.f32.mrb[3].mxu1 }
 0x193   : > { %v477_v39 = vpop.f32.mrb[4].mxu1 }
 0x194   : > { %v479_v42 = vpop.f32.mrb[5].mxu1 }
 0x1fa   : > { %v563_v56 = vpop.f32.mrb[0].mxu0 }
 0x1fb   : > { %v564_v58 = vadd.f32 %v563_v56, %v465_v25  ;;  %v565_v59 = vpop.f32.mrb[1].mxu0  ;;  %v1097_v25 = vld [vmem:[%s1817_s5] ss:$0 sm:$0xff] }
 0x1fc   : > { %v566_v60 = vadd.f32 %v565_v59, %v467_v29 }
 0x1fd   : > { %v592_v61 = vadd.f32 %v585_v55, %v564_v58 }
 0x1fe   : > { %v593_v62 = vadd.f32 %v589_v57, %v566_v60  ;;  %v569_v63 = vpop.f32.mrb[2].mxu0 }
 0x1ff   : > { %v570_v0 = vadd.f32 %v569_v63, %v471_v34  ;;  %v571_v1 = vpop.f32.mrb[3].mxu0  ;;  %v598_v4 = vmax.f32 %v592_v61, 0.0 }
 0x200   : > { %v599_v2 = vmax.f32 %v593_v62, 0.0  ;;  %v572_v3 = vadd.f32 %v571_v1, %v473_v37 }
 0x201   : > { %v594_v5 = vadd.f32 %v585_v55, %v570_v0 }
 0x202   : > { %v595_v6 = vadd.f32 %v589_v57, %v572_v3  ;;  %v575_v7 = vpop.f32.mrb[4].mxu0  ;;  %707 = vmatprep.mubr.f32.mxu1 %v599_v2 }
 0x203   : > { %v576_v8 = vadd.f32 %v575_v7, %v477_v39  ;;  %v577_v9 = vpop.f32.mrb[5].mxu0  ;;  %708 = vmatmul.mubr.f32.vlgmr.msra.gmra.mrb[6].mxu1 %v598_v4  ;;  %v600_v12 = vmax.f32 %v594_v5, 0.0 }
 0x204   : > { %v601_v10 = vmax.f32 %v595_v6, 0.0  ;;  %v578_v11 = vadd.f32 %v577_v9, %v479_v42 }
 0x205   : > { %v596_v14 = vadd.f32 %v585_v55, %v576_v8 }
 0x206   : > { %v597_v15 = vadd.f32 %v589_v57, %v578_v11  ;;  %712 = vmatprep.mubr.f32.mxu1 %v601_v10 }
 0x207   : > { %713 = vmatmul.mubr.f32.gmra.mrb[8].mxu1 %v600_v12  ;;  %v602_v17 = vmax.f32 %v596_v14, 0.0 }
 0x208   : > { %v603_v16 = vmax.f32 %v597_v15, 0.0 }
 0x20a   : > { %717 = vmatprep.mubr.f32.mxu1 %v603_v16 }
 0x20b   : > { %718 = vmatmul.mubr.f32.gmra.mrb[10].mxu1 %v602_v17 }
 0x2d6   : > { %v1144_v24 = vpop.f32.mrb[6].mxu1 }
 0x2d7   : > { %v1145_v26 = vpop.f32.mrb[7].mxu1 }
 0x2d8   : > { %v1146_v27 = vadd.f32 %v1145_v26, %v1144_v24 }
 0x2da   : > { %v710_v28 = vadd.f32 %v1146_v27, %v1097_v25  ;;  %v1147_v29 = vpop.f32.mrb[8].mxu1 }
 0x2db   : > { %v1148_v30 = vpop.f32.mrb[9].mxu1 }
 0x2dc   : > { %v723_v31 = vmax.f32 %v710_v28, 0.0  ;;  %v1149_v32 = vadd.f32 %v1148_v30, %v1147_v29 }
 0x2de   : > { %v715_v33 = vadd.f32 %v1149_v32, %v1097_v25  ;;  %v1150_v34 = vpop.f32.mrb[10].mxu1  ;;  %1205 = vmatmul.mubr.f32.vlgmr.msra.gmra.mrb[6].mxu0 %v723_v31 }
 0x2df   : > { %v1151_v35 = vpop.f32.mrb[11].mxu1  ;;  %1207 = vmatprep.mubr.msk.f32.mxu0 %vm1536_vm1, %v1533_v13 }
 0x2e0   : > { %v724_v36 = vmax.f32 %v715_v33, 0.0  ;;  %v1152_v37 = vadd.f32 %v1151_v35, %v1150_v34 }
 0x2e2   : > { %v720_v38 = vadd.f32 %v1152_v37, %v1097_v25  ;;  %1208 = vmatmul.mubr.f32.gmra.mrb[8].mxu0 %v724_v36 }
 0x2e3   : > { %1210 = vmatprep.mubr.msk.f32.mxu0 %vm1536_vm1, %v1533_v13 }
 0x2e4   : > { %v725_v39 = vmax.f32 %v720_v38, 0.0 }
 0x2e6   : > { %1211 = vmatmul.mubr.f32.gmra.mrb[10].mxu0 %v725_v39 }
 0x3b1   : > { %v815_v41 = vpop.f32.mrb[6].mxu0 }
 0x3b2   : > { %v816_v42 = vadd.f32 %v1098_v40, %v815_v41  ;;  %v1206_v43 = vpop.f32.mrb[7].mxu0 }
 0x3b4   : > { %v829_v44 = vsub.f32 0.0, %v816_v42 }
 0x3b5   : > { %v820_v45 = vpop.f32.mrb[8].mxu0 }
 0x3b6   : > { %v832_v46 = vmul.f32 1.442695, %v829_v44  ;;  %v821_v47 = vadd.f32 %v1098_v40, %v820_v45  ;;  %v1209_v48 = vpop.f32.mrb[9].mxu0 }
 0x3b8   : > { %1392 = vpow2.f32 %v832_v46  ;;  %v830_v49 = vsub.f32 0.0, %v821_v47 }
 0x3b9   : > { %v825_v50 = vpop.f32.mrb[10].mxu0 }
 0x3ba   : > { %v834_v51 = vmul.f32 1.442695, %v830_v49  ;;  %v826_v13 = vadd.f32 %v1098_v40, %v825_v50  ;;  %v1212_v52 = vpop.f32.mrb[11].mxu0 }
 0x3bc   : > { %1394 = vpow2.f32 %v834_v51  ;;  %v831_v53 = vsub.f32 0.0, %v826_v13 }
 0x3be   : > { %v836_v54 = vmul.f32 1.442695, %v831_v53 }
 0x3c0   : > { %1396 = vpow2.f32 %v836_v54 }
 0x3c2   : > { %v1393_v55 = vpop.eup %1392 }
 0x3c3   : > { %v838_v56 = vadd.f32 1.0, %v1393_v55 }
 0x3c5   : > { %1398 = vrcp.f32 %v838_v56 }
 0x3c6   : > { %v1395_v57 = vpop.eup %1394 }
 0x3c7   : > { %v839_v58 = vadd.f32 1.0, %v1395_v57 }
 0x3c9   : > { %1400 = vrcp.f32 %v839_v58 }
 0x3ca   : > { %v1397_v59 = vpop.eup %1396 }
 0x3cb   : > { %v840_v60 = vadd.f32 1.0, %v1397_v59 }
 0x3cd   : > { %1402 = vrcp.f32 %v840_v60 }
 0x3cf   : > { %v1399_v61 = vpop.eup %1398 }
 0x3d0   : > { %844 = vst.msk [vmem:[%s1768_s16] sm:$0xff] %vm392_vm0, %v1399_v61 }
 0x3d2   : > { %853 = sbr.rel (!%p1829_p6) target bundleno = 1046 (0x416), region = 60 }
 0x3d3   : > { %v1401_v62 = vpop.eup %1400 }
 0x3d4   : > { %845 = vst.msk [vmem:[%s1768_s16 + $0x8] sm:$0xff] %vm392_vm0, %v1401_v62 }
 0x3d7   : > { %v1403_v63 = vpop.eup %1402 }
 0x3d8   : > { %846 = vst.msk [vmem:[%s1768_s16 + $0x10] sm:$0xff] %vm392_vm0, %v1403_v63 }
 0x3d9   : > { %s1834_s27 = smov (!%p856_p7, %s855_s27), 3 }
 0x3da   : > { %s1099_s14 = sshll.u32 %s1834_s27, 7 }
 0x3db   : > { %p1102_p9 = scmp.eq.s32.totalorder %s1099_s14, 0 }
 0x3dc   : > { %1404 = sdivrem.u32 (!%p1102_p9), %s1834_s27, 3 }
 0x3dd   : > { %864 = sbr.rel (%p1102_p9) target bundleno = 1046 (0x416), region = 64 }
 0x3e5   : > { %s1789_s13 = spop.drf %1404 }
 0x3e6   : > { %p1103_p13 = scmp.le.s32.totalorder %s1789_s13, 0 }
 0x3e7   : > { %s1496_s30 = smov (!%p1103_p13), %s1783_s24   ;;  %s1500_s15 = smov (!%p1103_p13), %s1768_s16  }
 0x3e8   : > { %1031 = sbr.rel (%p1103_p13) target bundleno = 1017 (0x3f9), region = 141  ;;  %s1504_s25 = smov (!%p1103_p13), 0  }
 0x3e9   : > { %s1508_s26 = smov (!%p1103_p13), 0  }
 0x3ef LB: >> { %v932_v0 = vld [vmem:[%s1502_s15] sm:$0xff]  ;;  %v934_v1 = vld [vmem:[%s1502_s15 + $0x8] sm:$0xff]  ;;  %v936_v2 = vld [vmem:[%s1502_s15 + $0x10] sm:$0xff]  ;;  %s938_s29 = sadd.s32 1, %s1506_s25  ;;  %s926_s26 = sadd.s32 1, %s1510_s26   ;;  %s1510_s26 = sphi %s1508_s26, %s926_s26   ;;  %s1506_s25 = sphi %s1504_s25, %s1505_s25   ;;  %s1502_s15 = sphi %s1500_s15, %s943_s15   ;;  %s1498_s30 = sphi %s1496_s30, %s944_s30  }
 0x3f0   : >> { %933 = vst [vmem:[%s1498_s30] sm:$0xff] %v932_v0  ;;  %935 = vst [vmem:[%s1498_s30 + $0x8] sm:$0xff] %v934_v1  ;;  %p939_p0 = scmp.ge.s32.totalorder %s938_s29, %s1789_s13  ;;  %p925_p1 = scmp.ge.s32.totalorder %s926_s26, %s1789_s13 }
 0x3f1   : >> { %937 = vst [vmem:[%s1498_s30 + $0x10] sm:$0xff] %v936_v2 }
 0x3f2   : >> { %s1836_s29 = smov (%p939_p0, %s938_s29), 0  ;;  %928 = sbr.rel (!%p925_p1) target bundleno = 1007 (0x3ef), region = 147 }
 0x3f3   : >> { %s941_s10 = smul.u32 24, %s1836_s29  ;;  %s1505_s25 = smov %s1836_s29  }
 0x3f5   : >> { %s943_s15 = scalar_lea.vmem %s1768_s16, %s941_s10 [#allocation4]   ;;  %s944_s30 = scalar_lea.vmem %s1783_s24, %s941_s10  }
 0x3f9 PF: > { %1406 = sdivrem.u32 %s1834_s27, 3 }
 0x3fa   : > { %s1104_s11 = smul.u32 24, %s1789_s13 }
 0x3fc   : > { %s949_s17 = scalar_lea.vmem %s1768_s16, %s1104_s11 [#allocation4]   ;;  %s951_s18 = scalar_lea.vmem %s1783_s24, %s1104_s11  }
 0x402   : > { %s1407_s19 = spop.drf %1406 }
 0x403   : > { %p1106_p2 = scmp.le.s32.totalorder %s1407_s19, 0 }
 0x404   : > { %s1512_s20 = smov (!%p1106_p2), %s951_s18   ;;  %s1516_s21 = smov (!%p1106_p2), %s949_s17  }
 0x405   : > { %1045 = sbr.rel (%p1106_p2) target bundleno = 1046 (0x416), region = 152  ;;  %s1520_s22 = smov (!%p1106_p2), 0  }
 0x406   : > { %s1524_s23 = smov (!%p1106_p2), 0  }
 0x40c LB: >> { %v961_v3 = vld [vmem:[%s1518_s21] sm:$0xff]  ;;  %s963_s14 = sadd.s32 1, %s1522_s22  ;;  %s955_s23 = sadd.s32 1, %s1526_s23   ;;  %s1526_s23 = sphi %s1524_s23, %s955_s23   ;;  %s1522_s22 = sphi %s1520_s22, %s1521_s22   ;;  %s1518_s21 = sphi %s1516_s21, %s968_s21   ;;  %s1514_s20 = sphi %s1512_s20, %s969_s20  }
 0x40d   : >> { %962 = vst [vmem:[%s1514_s20] sm:$0xff] %v961_v3  ;;  %p964_p3 = scmp.ge.s32.totalorder %s963_s14, %s1407_s19  ;;  %p954_p5 = scmp.ge.s32.totalorder %s955_s23, %s1407_s19 }
 0x40f   : >> { %s1838_s14 = smov (%p964_p3, %s963_s14), 0  ;;  %957 = sbr.rel (!%p954_p5) target bundleno = 1036 (0x40c), region = 158 }
 0x410   : >> { %s1107_s16 = sshll.u32 %s1838_s14, 3  ;;  %s1521_s22 = smov %s1838_s14  }
 0x411   : >> { %s968_s21 = scalar_lea.vmem %s949_s17, %s1107_s16 [#allocation4]   ;;  %s969_s20 = scalar_lea.vmem %s951_s18, %s1107_s16  }
 0x416 PF: > { %p16_p8 = scmp.ge.s32.totalorder %s1597_s9, 4   ;;  %s1830_s27 = smov %s1490_s28 }
 0x417   : > { %s1831_s28 = smov %s1605_s12  ;;  %s1832_s29 = smov %s1597_s9 }
 0x418   :  { %18 = sbr.rel (!%p16_p8) target bundleno = 2 (0x2), region = 169 }
 0x41f   :  { %985 = vsyncpa [#allocation3], 1 }
 0x420   :  { %987 = vsyncpa [#allocation3 + $0x1], 1 }

</bundles_post_ra>
